<compile_context>
chip_gen: v7x
topology: tpu7x:2x2x1
jax: 0.10.0
libtpu: 0.0.40
codegen_flags: <defaults>
</compile_context>

<pallas_src>
import jax
import jax.numpy as jnp
from jax import lax
from jax.experimental import pallas as pl
from jax.experimental.pallas import tpu as pltpu


# ----------------------------------------------------------------------------
# Fused kernel:  o = relu(x @ W^T + b)
#   x_ref: (tm, tk)      activation tile
#   w_ref: (tn, tk)      torch nn.Linear layout tile (contract on last axis)
#   b_ref: (1,  tn)      bias tile
#   o_ref: (tm, tn)      output tile
#   acc  : (tm, tn) f32  accumulator scratch (resident across the K axis)
# ----------------------------------------------------------------------------
def _intermediate_kernel(x_ref, w_ref, b_ref, o_ref, acc_ref):
    k = pl.program_id(2)

    @pl.when(k == 0)
    def _():
        acc_ref[...] = jnp.zeros_like(acc_ref)

    # Contract x's last dim against w's last dim -> handles the torch (out, in)
    # layout natively on the MXU, no transpose op needed.
    acc_ref[...] += lax.dot_general(
        x_ref[...], w_ref[...],
        dimension_numbers=(((1,), (1,)), ((), ())),
        preferred_element_type=jnp.float32,
    )

    @pl.when(k == pl.num_programs(2) - 1)
    def _():
        y = acc_ref[...] + b_ref[...].astype(jnp.float32)
        o_ref[...] = jnp.maximum(y, 0.0).astype(o_ref.dtype)


def _pick_tile(dim, cap):
    """Largest legal tile <= cap for a fixed (unpadded) array dim.

    Full extent if it fits; otherwise the largest multiple of 128 that divides
    the dim (lane/sublane friendly, no masked stores); else fall back to full.
    """
    if dim <= cap:
        return dim
    t = (cap // 128) * 128
    while t >= 128:
        if dim % t == 0:
            return t
        t -= 128
    return dim


def intermediate_forward(x, w, b, *, block_rows=256, block_cols=512, block_k=512):
    """relu(x @ w.T + b) as a single fused pallas_call.

    x: (..., din)   — arbitrary leading dims (flattened to rows)
    w: (dout, din)  — PyTorch nn.Linear weight convention
    b: (dout,)
    returns: (..., dout)
    """
    orig_shape = x.shape
    din = orig_shape[-1]
    dout = w.shape[0]

    x2 = x.reshape(-1, din)
    m = x2.shape[0]

    # Row tile: multiple of 8 sublanes, capped at block_rows; pad tail rows.
    tm = min(block_rows, ((m + 7) // 8) * 8)
    tm = ((tm + 7) // 8) * 8
    mp = pl.cdiv(m, tm) * tm
    if mp != m:
        x2 = jnp.pad(x2, ((0, mp - m), (0, 0)))

    # Output-feature and contraction tiles (fixed dims -> divisor-based tiles).
    tn = _pick_tile(dout, block_cols)
    tk = _pick_tile(din, block_k)

    grid = (mp // tm, dout // tn, din // tk)

    out = pl.pallas_call(
        _intermediate_kernel,
        out_shape=jax.ShapeDtypeStruct((mp, dout), x.dtype),
        grid_spec=pltpu.PrefetchScalarGridSpec(
            num_scalar_prefetch=0,
            grid=grid,
            in_specs=[
                pl.BlockSpec((tm, tk), lambda i, j, k: (i, k)),   # activation
                pl.BlockSpec((tn, tk), lambda i, j, k: (j, k)),   # weight (out,in)
                pl.BlockSpec((1, tn), lambda i, j, k: (0, j)),    # bias
            ],
            out_specs=pl.BlockSpec((tm, tn), lambda i, j, k: (i, j)),
            scratch_shapes=[pltpu.VMEM((tm, tn), jnp.float32)],
        ),
        compiler_params=pltpu.CompilerParams(
            dimension_semantics=("parallel", "parallel", "arbitrary"),
        ),
    )(x2, w, b.reshape(1, dout))

    return out[:m].reshape(*orig_shape[:-1], dout)


# ----------------------------------------------------------------------------
# Pure-JAX reference matching the PyTorch forward exactly.
# ----------------------------------------------------------------------------
def reference(x, w, b):
    return jnp.maximum(x @ w.T + b, 0.0)


if __name__ == "__main__":
    batch, seq, hidden_size, intermediate_size = 2, 8, 32, 128

    root = jax.random.PRNGKey(0)
    k_x, k_w, k_b = jax.random.split(root, 3)

    hidden_states = jax.random.normal(k_x, (batch, seq, hidden_size), jnp.float32)
    w = jax.random.normal(k_w, (intermediate_size, hidden_size), jnp.float32) * 0.1
    b = jax.random.normal(k_b, (intermediate_size,), jnp.float32) * 0.1

    out = intermediate_forward(hidden_states, w, b)
    out = jax.block_until_ready(out)

    ref = reference(hidden_states, w, b)
    assert out.shape == (batch, seq, intermediate_size)
    if not jnp.allclose(out, ref, rtol=1e-4, atol=1e-5):
        raise AssertionError("Pallas kernel output mismatches JAX reference")

    print("KERNEL_OK")
</pallas_src>

<mosaic_0001>
module attributes {stable_mosaic.version = 11 : i64} {
  func.func @_intermediate_kernel(%arg0: i32, %arg1: i32, %arg2: i32, %arg3: memref<16x32xf32, #tpu.memory_space<vmem>>, %arg4: memref<128x32xf32, #tpu.memory_space<vmem>>, %arg5: memref<1x128xf32, #tpu.memory_space<vmem>>, %arg6: memref<16x128xf32, #tpu.memory_space<vmem>>, %arg7: memref<16x128xf32, #tpu.memory_space<vmem>>) attributes {dimension_semantics = [#tpu.dimension_semantics<parallel>, #tpu.dimension_semantics<parallel>, #tpu.dimension_semantics<arbitrary>], iteration_bounds = array<i64: 1, 1, 1>, scalar_prefetch = 0 : i64, scratch_operands = 1 : i64, tpu.core_type = #tpu.core_type<tc>, window_params = [{transform_indices = @transform_0, window_bounds = array<i64: 16, 32>}, {transform_indices = @transform_1, window_bounds = array<i64: 128, 32>}, {transform_indices = @transform_2, window_bounds = array<i64: 1, 128>}, {transform_indices = @transform_3, window_bounds = array<i64: 16, 128>}]} {
    %c0_i32 = arith.constant 0 : i32
    %0 = arith.cmpi eq, %arg2, %c0_i32 : i32
    %1 = arith.extui %0 : i1 to i32
    %c0_i32_0 = arith.constant 0 : i32
    %2 = arith.cmpi ne, %1, %c0_i32_0 : i32
    scf.if %2 {
      %cst_10 = arith.constant 0.000000e+00 : f32
      %12 = vector.broadcast %cst_10 : f32 to vector<16x128xf32>
      %c0_11 = arith.constant 0 : index
      %c0_12 = arith.constant 0 : index
      %13 = vector.load %arg7[%c0_11, %c0_12] : memref<16x128xf32, #tpu.memory_space<vmem>>, vector<16x128xf32>
      tpu.vector_store %arg7[%c0_11, %c0_12], %12 {strides = array<i32>} : memref<16x128xf32, #tpu.memory_space<vmem>>, vector<16x128xf32>,
    } else {
    }
    %c0 = arith.constant 0 : index
    %c0_1 = arith.constant 0 : index
    %3 = vector.load %arg7[%c0, %c0_1] : memref<16x128xf32, #tpu.memory_space<vmem>>, vector<16x128xf32>
    %c0_2 = arith.constant 0 : index
    %c0_3 = arith.constant 0 : index
    %4 = vector.load %arg3[%c0_2, %c0_3] : memref<16x32xf32, #tpu.memory_space<vmem>>, vector<16x32xf32>
    %c0_4 = arith.constant 0 : index
    %c0_5 = arith.constant 0 : index
    %5 = vector.load %arg4[%c0_4, %c0_5] : memref<128x32xf32, #tpu.memory_space<vmem>>, vector<128x32xf32>
    %cst = arith.constant dense<0.000000e+00> : vector<16x128xf32>
    %6 = tpu.matmul %4, %5, %cst {dimension_numbers = #tpu.dot_dimension_numbers<[1], [1], [0], [0], [0, 0, 1, 0], [], []>} : vector<16x32xf32>, vector<128x32xf32>, vector<16x128xf32> -> vector<16x128xf32>
    %7 = arith.addf %3, %6 : vector<16x128xf32>
    %c0_6 = arith.constant 0 : index
    %c0_7 = arith.constant 0 : index
    %8 = vector.load %arg7[%c0_6, %c0_7] : memref<16x128xf32, #tpu.memory_space<vmem>>, vector<16x128xf32>
    tpu.vector_store %arg7[%c0_6, %c0_7], %7 {strides = array<i32>} : memref<16x128xf32, #tpu.memory_space<vmem>>, vector<16x128xf32>,
    %c0_i32_8 = arith.constant 0 : i32
    %9 = arith.cmpi eq, %arg2, %c0_i32_8 : i32
    %10 = arith.extui %9 : i1 to i32
    %c0_i32_9 = arith.constant 0 : i32
    %11 = arith.cmpi ne, %10, %c0_i32_9 : i32
    scf.if %11 {
      %c0_10 = arith.constant 0 : index
      %c0_11 = arith.constant 0 : index
      %12 = vector.load %arg7[%c0_10, %c0_11] : memref<16x128xf32, #tpu.memory_space<vmem>>, vector<16x128xf32>
      %c0_12 = arith.constant 0 : index
      %c0_13 = arith.constant 0 : index
      %13 = vector.load %arg5[%c0_12, %c0_13] : memref<1x128xf32, #tpu.memory_space<vmem>>, vector<1x128xf32>
      %14 = vector.broadcast %13 : vector<1x128xf32> to vector<16x128xf32>
      %15 = arith.addf %12, %14 : vector<16x128xf32>
      %cst_14 = arith.constant 0.000000e+00 : f32
      %16 = vector.broadcast %cst_14 : f32 to vector<16x128xf32>
      %17 = arith.maximumf %15, %16 : vector<16x128xf32>
      %c0_15 = arith.constant 0 : index
      %c0_16 = arith.constant 0 : index
      %18 = vector.load %arg6[%c0_15, %c0_16] : memref<16x128xf32, #tpu.memory_space<vmem>>, vector<16x128xf32>
      tpu.vector_store %arg6[%c0_15, %c0_16], %17 {strides = array<i32>} : memref<16x128xf32, #tpu.memory_space<vmem>>, vector<16x128xf32>,
    } else {
    }
    return
  }
  func.func @transform_0(%arg0: i32, %arg1: i32, %arg2: i32) -> (i32, i32) {
    %c0_i32 = arith.constant 0 : i32
    return %arg0, %arg2 : i32, i32
  }
  func.func @transform_1(%arg0: i32, %arg1: i32, %arg2: i32) -> (i32, i32) {
    %c0_i32 = arith.constant 0 : i32
    return %arg1, %arg2 : i32, i32
  }
  func.func @transform_2(%arg0: i32, %arg1: i32, %arg2: i32) -> (i32, i32) {
    %c0_i32 = arith.constant 0 : i32
    %c0_i32_0 = arith.constant 0 : i32
    return %c0_i32, %arg1 : i32, i32
  }
  func.func @transform_3(%arg0: i32, %arg1: i32, %arg2: i32) -> (i32, i32) {
    %c0_i32 = arith.constant 0 : i32
    return %arg0, %arg1 : i32, i32
  }
}

</mosaic_0001>

<bundles_post_ra>
// kernel: tpu_custom_call.1
= control target key start
LH: loop header
LB: loop body
LE: loop exit
PB: predicated region body
PF: predicated region fallthrough
CT: control target
= control target key end

     0   :  { %vm41_vm0 = vcmask 261120   ;;  %s488_s0 = inlined_call_operand.vmem [shape: f32[16,32], index: 0, kind: input, shape index: {}]   ;;  %s489_s1 = inlined_call_operand.vmem [shape: f32[128,32], index: 1, kind: input, shape index: {}]   ;;  %s490_s2 = inlined_call_operand.vmem [shape: f32[1,128], index: 2, kind: input, shape index: {}]   ;;  %s491_s3 = inlined_call_operand.hbm [shape: f32[16,128], index: 3, kind: output, shape index: {}]  }
   0x1   :  { %v25_v0 = vld [vmem:[%s489_s1] sm:$0xff]  ;;  %v26_v1 = vld [vmem:[%s489_s1 + $0x8] sm:$0xff]  ;;  %v27_v2 = vld [vmem:[%s489_s1 + $0x10] sm:$0xff] }
   0x2   :  { %v281_v3 = vpack.c.bf16 %v26_v1, %v25_v0  ;;  %vm390_vm1 = vmpackc.low %vm41_vm0, %vm41_vm0  ;;  %v28_v5 = vld [vmem:[%s489_s1 + $0x18] sm:$0xff]  ;;  %v23_v7 = vld [vmem:[%s488_s0] sm:$0xff] }
   0x3   :  { %v287_v6 = vpack.c.bf16 %v28_v5, %v27_v2  ;;  %v29_v8 = vld [vmem:[%s489_s1 + $0x20] sm:$0xff]  ;;  %v30_v9 = vld [vmem:[%s489_s1 + $0x28] sm:$0xff]  ;;  %278 = vmatprep.mubr.msk.f32.mxu0 %vm41_vm0, %v23_v7 }
   0x4   :  { %283 = vmatprep.subr.msk.bf16.mxu0 %vm390_vm1, %v281_v3 }
   0x5   :  { %286 = vmatpush3.bf16.xpose.msk.msra.mxu0 %vm390_vm1, %v281_v3 }
   0x6   :  { %289 = vmatprep.subr.msk.bf16.mxu0 %vm390_vm1, %v287_v6 }
   0x7   :  { %8 = vsyncpa [#allocation4], 0  ;;  %v293_v10 = vpack.c.bf16 %v30_v9, %v29_v8  ;;  %v31_v11 = vld [vmem:[%s489_s1 + $0x30] sm:$0xff]  ;;  %v32_v12 = vld [vmem:[%s489_s1 + $0x38] sm:$0xff] }
   0x8   :  { %v299_v13 = vpack.c.bf16 %v32_v12, %v31_v11  ;;  %v33_v14 = vld [vmem:[%s489_s1 + $0x40] sm:$0xff]  ;;  %v34_v15 = vld [vmem:[%s489_s1 + $0x48] sm:$0xff]  ;;  %v35_v17 = vld [vmem:[%s489_s1 + $0x50] sm:$0xff] }
   0x9   :  { %v305_v16 = vpack.c.bf16 %v34_v15, %v33_v14  ;;  %v36_v18 = vld [vmem:[%s489_s1 + $0x58] sm:$0xff]  ;;  %v37_v20 = vld [vmem:[%s489_s1 + $0x60] sm:$0xff]  ;;  %v38_v21 = vld [vmem:[%s489_s1 + $0x68] sm:$0xff] }
   0xa   :  { %v311_v19 = vpack.c.bf16 %v36_v18, %v35_v17  ;;  %v317_v22 = vpack.c.bf16 %v38_v21, %v37_v20  ;;  %v39_v23 = vld [vmem:[%s489_s1 + $0x70] sm:$0xff]  ;;  %v40_v24 = vld [vmem:[%s489_s1 + $0x78] sm:$0xff]  ;;  %v24_v26 = vld [vmem:[%s488_s0 + $0x8] sm:$0xff]  ;;  %s356_s1 = smov [#allocation3]  }
   0xb   :  { %v323_v25 = vpack.c.bf16 %v40_v24, %v39_v23  ;;  %v227_v27 = vld [vmem:[%s490_s2] ss:$0 sm:$0xff]  ;;  %s198_s23 = sshll.u32 %s356_s1, 4  ;;  %s199_s23 = int_to_ptr.vmem [resolvable:$true] %s198_s23 }
   0xc   :  { %s332_s24 = scalar_lea.vmem %s199_s23, 256  ;;  %p337_p1 = scmp.lt.s32.totalorder %s199_s23, %s199_s23 }
   0xd   :  { %292 = vmatpush3.bf16.xpose.msk.msra.mxu0 %vm390_vm1, %v287_v6  ;;  %p333_p0 = scmp.ne.s32.totalorder %s199_s23, %s332_s24  ;;  %p338_p2 = scmp.lt.s32.totalorder %s332_s24, %s332_s24 }
   0xe   :  { %295 = vmatprep.subr.msk.bf16.mxu0 %vm390_vm1, %v293_v10 }
   0xf   :  { %p339_p3 = por %p338_p2, %p337_p1 }
  0x11   :  { %p340_p4 = pnand %p339_p3, %p333_p0 }
  0x15   :  { %298 = vmatpush3.bf16.xpose.msk.msra.mxu0 %vm390_vm1, %v293_v10 }
  0x16   :  { %301 = vmatprep.subr.msk.bf16.mxu0 %vm390_vm1, %v299_v13 }
  0x1d   :  { %304 = vmatpush3.bf16.xpose.msk.msra.mxu0 %vm390_vm1, %v299_v13 }
  0x1e   :  { %307 = vmatprep.subr.msk.bf16.mxu0 %vm390_vm1, %v305_v16 }
  0x25   :  { %310 = vmatpush3.bf16.xpose.msk.msra.mxu0 %vm390_vm1, %v305_v16 }
  0x26   :  { %313 = vmatprep.subr.msk.bf16.mxu0 %vm390_vm1, %v311_v19 }
  0x2d   :  { %316 = vmatpush3.bf16.xpose.msk.msra.mxu0 %vm390_vm1, %v311_v19 }
  0x2e   :  { %319 = vmatprep.subr.msk.bf16.mxu0 %vm390_vm1, %v317_v22 }
  0x35   :  { %322 = vmatpush3.bf16.xpose.msk.msra.mxu0 %vm390_vm1, %v317_v22 }
  0x36   :  { %325 = vmatprep.subr.msk.bf16.mxu0 %vm390_vm1, %v323_v25 }
  0x3d   :  { %328 = vmatpush3.bf16.xpose.msk.msra.mxu0 %vm390_vm1, %v323_v25 }
  0x44   :  { %279 = vmatmul.mubr.msk.f32.vlgmr.msra.gmra.mrb[0].mxu0 %vm41_vm0, %v24_v26 }
 0x117   :  { %v280_v28 = vpop.f32.mrb[0].mxu0 }
 0x118   :  { %v188_v29 = vadd.f32 %v280_v28, %v227_v27  ;;  %v162_v30 = vpop.f32.mrb[1].mxu0 }
 0x119   :  { %v187_v31 = vadd.f32 %v227_v27, %v162_v30 }
 0x11a   :  { %v190_v32 = vmax.f32 %v188_v29, 0.0 }
 0x11b   :  { %v189_v33 = vmax.f32 %v187_v31, 0.0 }
 0x11c   :  { %192 = vst [vmem:[#allocation3 + $0x8] sm:$0xff] %v190_v32 }
 0x11d   :  { %191 = vst [vmem:[#allocation3] sm:$0xff] %v189_v33 }
 0x11e   :  { %343 = shalt.err (!%p340_p4)
}
 0x11f   :  { %s344_s25 = scalar_lea.hbm %s491_s3, 256 }
 0x120   :  { %p345_p5 = scmp.ne.s32.totalorder %s491_s3, %s344_s25  ;;  %p348_p6 = scmp.lt.u32.totalorder %s344_s25, %s491_s3 }
 0x122   :  { %p350_p7 = pnand %p348_p6, %p345_p5 }
 0x124   :  { %353 = shalt.err (!%p350_p7)
}
 0x125   :  { %s357_s30 = smov 128   ;;  %s358_s4 = smov 8  }
 0x126   :  { %204 = dma.vmem_to_hbm [thread:$0]  %s199_s23, 256, %s491_s3, [#allocation4], %s357_s30, %s357_s30, %s358_s4  }
 0x127   :  { %354 = dma.done.wait [#allocation4], 256  }
 0x128   :  { %355 = vsyncadd [#allocation4], 4294967040 }
 0x129   :  { %208 = vsyncpa [#allocation4], 1 }

</bundles_post_ra>
